<compile_context>
chip_gen: v7x
topology: tpu7x:2x2x1
jax: 0.10.0
libtpu: 0.0.40
codegen_flags: <defaults>
</compile_context>

<pallas_src>
import jax
import jax.numpy as jnp
from jax.experimental import pallas as pl
from jax.experimental.pallas import tpu as pltpu

NEG_INF = -1e30


# ----------------------------------------------------------------------------------
# conv1's shared projection: row-tiled dense matmul (subsequent projections are fused
# into the previous layer's attention kernel).
# ----------------------------------------------------------------------------------
def _project_kernel(x_ref, w_ref, o_ref):
    o_ref[...] = jnp.dot(x_ref[...], w_ref[...], preferred_element_type=jnp.float32)


def project(x, w, *, tq):
    n, d_in = x.shape
    d_out = w.shape[1]
    return pl.pallas_call(
        _project_kernel,
        out_shape=jax.ShapeDtypeStruct((n, d_out), jnp.float32),
        grid=(n // tq,),
        in_specs=[
            pl.BlockSpec((tq, d_in), lambda i: (i, 0)),
            pl.BlockSpec((d_in, d_out), lambda i: (0, 0)),
        ],
        out_specs=pl.BlockSpec((tq, d_out), lambda i: (i, 0)),
        compiler_params=pltpu.CompilerParams(dimension_semantics=("parallel",)),
    )(x, w)


# ----------------------------------------------------------------------------------
# One GATv2 layer (all heads) for a tile of tq query rows.  Emits either the NEXT
# layer's projection (non-last layers) or the final log_softmax rows (last layer).
# ----------------------------------------------------------------------------------
def make_gat_layer_kernel(num_heads, head_dim, n, neg_slope, act, has_next):
    def kernel(att_ref, adj_ref, hk_ref, hq_ref, *rest):
        if has_next:
            w_next_ref, out_ref = rest
        else:
            (out_ref,) = rest

        mask = adj_ref[...] > 0                      # (tq, N) bool, shared by all heads
        hk = hk_ref[...]                             # (N,  H*Fh) f32: keys / values
        hq = hq_ref[...]                             # (tq, H*Fh) f32: query rows
        ones_col = jnp.ones((n, 1), jnp.float32)     # hoisted (broadcast not CSE'd)

        head_outs = []
        for hd in range(num_heads):
            c0, c1 = hd * head_dim, (hd + 1) * head_dim
            h_k = hk[:, c0:c1]                       # (N,  Fh)
            h_q = hq[:, c0:c1]                       # (tq, Fh)
            h_kt = h_k.T                             # (Fh, N): one XLU transpose / head

            # --- rank-1 "linear" part of the split LeakyReLU:
            #     slope * sum_k a_k*(h_q[i,k] + h_k[j,k]) = slope*(u_q[i] + u_k[j])
            u_row = jnp.zeros((1, n), jnp.float32)
            u_col = jnp.zeros((h_q.shape[0], 1), jnp.float32)
            for k in range(head_dim):
                a_k = att_ref[c0 + k]                # scalar from SMEM
                u_row = u_row + a_k * h_kt[k:k + 1, :]
                u_col = u_col + a_k * h_q[:, k:k + 1]
            e = neg_slope * (u_col + u_row)          # (tq, N)

            # --- "relu" part: VALU-bound O(tq*N*Fh) loop, 3 VPU ops per element.
            for k in range(head_dim):
                c_k = (1.0 - neg_slope) * att_ref[c0 + k]
                s = h_q[:, k:k + 1] + h_kt[k:k + 1, :]          # broadcast add
                e = e + c_k * jnp.maximum(s, 0.0)               # max + fma

            # Edge mask once per head (no (N,N) f32 bias buffer); softmax over
            # neighbors with the divide deferred past the aggregation matmul.
            e = jnp.where(mask, e, NEG_INF)
            e = e - jnp.max(e, axis=1, keepdims=True)
            p = jnp.exp(e).astype(jnp.bfloat16)

            # Aggregation + folded denominator on the MXU: p @ [h_k | 1].
            h_aug = jnp.concatenate([h_k, ones_col], axis=1).astype(jnp.bfloat16)
            agg = jnp.dot(p, h_aug, preferred_element_type=jnp.float32)  # (tq, Fh+1)
            inv = pl.reciprocal(agg[:, head_dim:head_dim + 1], approx=True)
            y_h = agg[:, :head_dim] * inv                                # (tq, Fh)

            if act == "elu":
                y_h = jnp.where(y_h > 0.0, y_h, jnp.exp(jnp.minimum(y_h, 0.0)) - 1.0)
            elif act == "relu":
                y_h = jnp.maximum(y_h, 0.0)
            head_outs.append(y_h)

        # flatten(1): concat heads in registers -> one contiguous (tq, H*Fh) block.
        y = jnp.concatenate(head_outs, axis=1)

        if has_next:
            # Next layer's projection as ONE matmul with K = H*Fh; single full store.
            out_ref[...] = jnp.dot(y, w_next_ref[...], preferred_element_type=jnp.float32)
        else:
            # Final F.log_softmax(dim=1); single lane-dense full-width store.
            z = y - jnp.max(y, axis=1, keepdims=True)
            out_ref[...] = z - jnp.log(jnp.sum(jnp.exp(z), axis=1, keepdims=True))

    return kernel


def gat_layer(adj_i8, hh, att_flat, w_next, *, num_heads, head_dim, tq, neg_slope, act):
    n, hfh = hh.shape
    has_next = w_next is not None
    out_dim = w_next.shape[1] if has_next else hfh
    kernel = make_gat_layer_kernel(num_heads, head_dim, n, neg_slope, act, has_next)

    in_specs = [
        pl.BlockSpec(memory_space=pltpu.MemorySpace.SMEM),   # att: 1-D scalar table
        pl.BlockSpec((tq, n), lambda i: (i, 0)),             # int8 adjacency row tile
        pl.BlockSpec((n, hfh), lambda i: (0, 0)),            # h for all nodes (resident)
        pl.BlockSpec((tq, hfh), lambda i: (i, 0)),           # h for the query rows
    ]
    operands = [att_flat, adj_i8, hh, hh]
    if has_next:
        in_specs.append(pl.BlockSpec(w_next.shape, lambda i: (0, 0)))
        operands.append(w_next)

    return pl.pallas_call(
        kernel,
        out_shape=jax.ShapeDtypeStruct((n, out_dim), jnp.float32),
        grid=(n // tq,),
        in_specs=in_specs,
        out_specs=pl.BlockSpec((tq, out_dim), lambda i: (i, 0)),
        compiler_params=pltpu.CompilerParams(dimension_semantics=("parallel",)),
    )(*operands)


# ----------------------------------------------------------------------------------
# Whole-network forward (eval mode): conv1 -> hidden layers -> conv2 + log_softmax.
# ----------------------------------------------------------------------------------
def net_forward(params, x, adj_i8, *, neg_slope, tq=None):
    n = x.shape[0]
    layers = [params["conv1"]] + list(params["hidden"]) + [params["conv2"]]
    if tq is None:
        tq = n
    assert n % tq == 0, "query-row tile size must divide N"

    hh = project(x, layers[0]["w"], tq=tq)           # conv1's shared projection

    for li, lp in enumerate(layers):
        num_heads, head_dim = lp["att"].shape
        is_last = li == len(layers) - 1
        att_flat = lp["att"].reshape(-1)             # 1-D SMEM table (no 2-D padding)
        w_next = None if is_last else layers[li + 1]["w"]
        act = None if is_last else ("elu" if li == 0 else "relu")  # dropout = identity
        hh = gat_layer(adj_i8, hh, att_flat, w_next,
                       num_heads=num_heads, head_dim=head_dim,
                       tq=tq, neg_slope=neg_slope, act=act)
    return hh                                        # last call = log_softmax rows


def init_gatv2_params(key, in_dim, out_dim, num_heads):
    head_dim = out_dim // num_heads
    kw, ka = jax.random.split(key)
    w = jax.random.normal(kw, (in_dim, out_dim), jnp.float32) / jnp.sqrt(jnp.float32(in_dim))
    att = jax.random.normal(ka, (num_heads, head_dim), jnp.float32) / jnp.sqrt(jnp.float32(head_dim))
    return {"w": w, "att": att}


def init_net_params(key, in_feats, hidden_feats, out_feats, num_heads, num_layers):
    keys = jax.random.split(key, num_layers)
    return {
        "conv1": init_gatv2_params(keys[0], in_feats, hidden_feats, num_heads),
        "hidden": [
            init_gatv2_params(keys[i + 1], hidden_feats, hidden_feats, num_heads)
            for i in range(num_layers - 2)
        ],
        "conv2": init_gatv2_params(keys[-1], hidden_feats, out_feats, num_heads),
    }


if __name__ == "__main__":
    # Small synthetic config consistent with Net(in_feats, hidden_feats, out_feats,
    # dropout, alpha, num_layers).  N=64 / tq=32 -> grid=(2,) exercises the row-tiled
    # "parallel" pipeline and keeps the int8 adjacency row tile (32, N) sublane-legal.
    N = 64
    in_feats, hidden_feats, out_feats = 8, 16, 8
    num_heads = 2              # hidden/out dims split across heads, concat restores them
    num_layers = 3             # conv1 + 1 hidden + conv2
    dropout, alpha = 0.5, 0.2  # dropout unused at inference; alpha = LeakyReLU slope
    tq = 32

    key = jax.random.PRNGKey(0)
    kx, kg, kp = jax.random.split(key, 3)

    # inputInfo.x : node features
    x = jax.random.normal(kx, (N, in_feats), jnp.float32)

    # inputInfo graph: deterministic random symmetric graph + self-loops, stored int8.
    rand_adj = jax.random.uniform(kg, (N, N)) < 0.25
    adj_i8 = (rand_adj | rand_adj.T | jnp.eye(N, dtype=bool)).astype(jnp.int8)

    params = init_net_params(kp, in_feats, hidden_feats, out_feats, num_heads, num_layers)

    out = net_forward(params, x, adj_i8, neg_slope=alpha, tq=tq)
    out = jax.block_until_ready(out)

    assert out.shape == (N, out_feats)
    assert bool(jnp.all(jnp.isfinite(out)))
    # log_softmax rows must exponentiate-sum to 1
    assert bool(jnp.all(jnp.abs(jnp.exp(out).sum(axis=1) - 1.0) < 1e-3))
    print("KERNEL_OK")
</pallas_src>

<mosaic_0001>
module attributes {stable_mosaic.version = 11 : i64} {
  func.func @_project_kernel(%arg0: i32, %arg1: memref<32x8xf32, #tpu.memory_space<vmem>>, %arg2: memref<8x16xf32, #tpu.memory_space<vmem>>, %arg3: memref<32x16xf32, #tpu.memory_space<vmem>>) attributes {dimension_semantics = [#tpu.dimension_semantics<parallel>], iteration_bounds = array<i64: 2>, scalar_prefetch = 0 : i64, scratch_operands = 0 : i64, tpu.core_type = #tpu.core_type<tc>, window_params = [{transform_indices = @transform_0, window_bounds = array<i64: 32, 8>}, {pipeline_mode = #tpu.pipeline_mode<synchronous>, transform_indices = @transform_1, window_bounds = array<i64: 8, 16>}, {transform_indices = @transform_2, window_bounds = array<i64: 32, 16>}]} {
    %c0 = arith.constant 0 : index
    %c0_0 = arith.constant 0 : index
    %0 = vector.load %arg1[%c0, %c0_0] : memref<32x8xf32, #tpu.memory_space<vmem>>, vector<32x8xf32>
    %c0_1 = arith.constant 0 : index
    %c0_2 = arith.constant 0 : index
    %1 = vector.load %arg2[%c0_1, %c0_2] : memref<8x16xf32, #tpu.memory_space<vmem>>, vector<8x16xf32>
    %cst = arith.constant dense<0.000000e+00> : vector<32x16xf32>
    %2 = tpu.matmul %0, %1, %cst {dimension_numbers = #tpu.dot_dimension_numbers<[1], [0], [0], [1], [0, 0, 1, 1], [], []>} : vector<32x8xf32>, vector<8x16xf32>, vector<32x16xf32> -> vector<32x16xf32>
    %c0_3 = arith.constant 0 : index
    %c0_4 = arith.constant 0 : index
    %3 = vector.load %arg3[%c0_3, %c0_4] : memref<32x16xf32, #tpu.memory_space<vmem>>, vector<32x16xf32>
    tpu.vector_store %arg3[%c0_3, %c0_4], %2 {strides = array<i32>} : memref<32x16xf32, #tpu.memory_space<vmem>>, vector<32x16xf32>,
    return
  }
  func.func @transform_0(%arg0: i32) -> (i32, i32) {
    %c0_i32 = arith.constant 0 : i32
    %c0_i32_0 = arith.constant 0 : i32
    return %arg0, %c0_i32 : i32, i32
  }
  func.func @transform_1(%arg0: i32) -> (i32, i32) {
    %c0_i32 = arith.constant 0 : i32
    %c0_i32_0 = arith.constant 0 : i32
    %c0_i32_1 = arith.constant 0 : i32
    return %c0_i32, %c0_i32_0 : i32, i32
  }
  func.func @transform_2(%arg0: i32) -> (i32, i32) {
    %c0_i32 = arith.constant 0 : i32
    %c0_i32_0 = arith.constant 0 : i32
    return %arg0, %c0_i32 : i32, i32
  }
}

</mosaic_0001>

<bundles_post_ra>
// kernel: tpu_custom_call.1
= control target key start
LH: loop header
LB: loop body
LE: loop exit
PB: predicated region body
PF: predicated region fallthrough
CT: control target
= control target key end

     0   :  { %s372_s9 = smov 0   ;;  %s392_s0 = inlined_call_operand.vmem [shape: f32[64,8], index: 0, kind: input, shape index: {}]   ;;  %s393_s1 = inlined_call_operand.vmem [shape: f32[8,16], index: 1, kind: input, shape index: {}]   ;;  %s394_s2 = inlined_call_operand.vmem [shape: f32[64,16], index: 2, kind: output, shape index: {}]  }
   0x1 LB: > { %s311_s10 = sadd.s32 4294967295, %s355_s9   ;;  %p315_p0 = scmp.ge.s32.totalorder %s355_s9, 1  ;;  %s355_s9 = sphi %s372_s9, %s12_s9  }
   0x2   : > { %p113_p1 = scmp.lt.s32.totalorder %s355_s9, 3 }
   0x4   : > { %p114_p2 = pnand %p315_p0, %p113_p1 }
   0x5   : > { %v151_v0 = vld [vmem:[%s393_s1] sm:$0xff] (!%p114_p2)  ;;  %s316_s13 = sshll.u32 (!%p114_p2), %s311_s10, 2  ;;  %vm152_vm0 = vcmask (!%p114_p2), 64512   ;;  %vm250_vm1 = vcmask (!%p114_p2), 130048  }
   0x6   : > { %117 = sbr.rel (%p114_p2) target bundleno = 232 (0xe8), region = 28  ;;  %331 = vmatprep.subr.mxu0 (!%p114_p2), %v151_v0  ;;  %339 = vmatprep.subr.mxu1 (!%p114_p2), %v151_v0  ;;  %p136_p3 = scmp.lt.s32.totalorder (!%p114_p2), %s316_s13, 7 }
   0x7   : > { %332 = vmatpush3.msra.mxu0 (!%p114_p2), %v151_v0  ;;  %340 = vmatpush3.msra.mxu1 (!%p114_p2), %v151_v0 }
   0xd   : > { %s396_s13 = smov (!%p136_p3, %s316_s13), 7 }
   0xe   : > { %s317_s14 = sshll.u32 %s396_s13, 3 }
   0xf   : > { %s139_s17 = scalar_lea.vmem %s392_s0, %s317_s14  ;;  %s145_s20 = scalar_lea.vmem %s394_s2, %s317_s14 }
  0x10   : > { %v147_v1 = vld [vmem:[%s139_s17] sm:$0xff]  ;;  %v148_v2 = vld [vmem:[%s139_s17 + $0x8] sm:$0xff]  ;;  %v149_v3 = vld [vmem:[%s139_s17 + $0x10] sm:$0xff] }
  0x11   : > { %333 = vmatprep.mubr.msk.f32.mxu0 %vm152_vm0, %v147_v1  ;;  %336 = vmatprep.mubr.msk.f32.mxu1 %vm152_vm0, %v149_v3  ;;  %v150_v4 = vld [vmem:[%s139_s17 + $0x18] sm:$0xff] }
  0x12   : > { %334 = vmatmul.mubr.msk.f32.vlgmr.msra.gmra.mrb[0].mxu0 %vm152_vm0, %v148_v2  ;;  %337 = vmatmul.mubr.msk.f32.vlgmr.msra.gmra.mrb[0].mxu1 %vm152_vm0, %v150_v4 }
  0xe5   : > { %v335_v5 = vpop.f32.mrb[0].mxu0  ;;  %v338_v6 = vpop.f32.mrb[0].mxu1 }
  0xe6   : > { %v231_v7 = vpop.f32.mrb[1].mxu0  ;;  %v241_v8 = vpop.f32.mrb[1].mxu1  ;;  %252 = vst.msk [vmem:[%s145_s20 + $0x8] sm:$0xff] %vm250_vm1, %v335_v5  ;;  %254 = vst.msk [vmem:[%s145_s20 + $0x18] sm:$0xff] %vm250_vm1, %v338_v6 }
  0xe7   : > { %251 = vst.msk [vmem:[%s145_s20] sm:$0xff] %vm250_vm1, %v231_v7  ;;  %253 = vst.msk [vmem:[%s145_s20 + $0x10] sm:$0xff] %vm250_vm1, %v241_v8 }
  0xe8 PF: > { %s12_s9 = sadd.s32 1, %s355_s9  }
  0xe9   : > { %p9_p4 = scmp.ge.s32.totalorder %s12_s9, 4  }
  0xeb   :  { %11 = sbr.rel (!%p9_p4) target bundleno = 1 (0x1), region = 58 }

</bundles_post_ra>
